<compile_context>
chip_gen: v7x
topology: tpu7x:2x2x1
jax: 0.10.0
libtpu: 0.0.40
codegen_flags: <defaults>
</compile_context>

<pallas_src>
import jax
import jax.numpy as jnp
from jax import lax
from jax.experimental import pallas as pl
from jax.experimental.pallas import tpu as pltpu

EPS = 1e-5


# --------------------------------- kernel ---------------------------------
def _cov_kernel(f_real_ref, f_fake_ref, out_ref):
    """Per-(branch, batch) covariance accumulation.

    grid = (2, B, n_k)  -> (branch "parallel", batch "parallel", HW-chunk "arbitrary")

    f_real_ref / f_fake_ref : VMEM (C, tk) feature chunk (only the branch-selected one
                              streams; the other is pinned to a constant block index).
    out_ref                 : VMEM (C, C) f32 — resident across the k axis, accumulates
                              f @ f.T for the current (branch, batch).
    """
    br = pl.program_id(0)
    k = pl.program_id(2)

    @pl.when(k == 0)
    def _init():
        out_ref[...] = jnp.zeros_like(out_ref)

    @pl.when(br == 0)
    def _real():
        f = f_real_ref[...]                       # (C, tk): contract lane axis, no transpose
        out_ref[...] += lax.dot_general(
            f, f, dimension_numbers=(((1,), (1,)), ((), ())),
            preferred_element_type=jnp.float32)

    @pl.when(br == 1)
    def _fake():
        f = f_fake_ref[...]
        out_ref[...] += lax.dot_general(
            f, f, dimension_numbers=(((1,), (1,)), ((), ())),
            preferred_element_type=jnp.float32)


# --------------------------------- tiling ---------------------------------
def _round_up(x, m):
    return ((x + m - 1) // m) * m


def _choose_tk(hw, c, dtype_bytes, n_f_inputs=2, budget_bytes=24 << 20):
    """Largest lane-aligned HW chunk that keeps the pipeline inside a v7x-safe VMEM budget."""
    out_buf = 2 * c * c * 4                        # double-buffered (C, C) f32 output
    per_k = n_f_inputs * 2 * c * dtype_bytes       # double-buffered (C, tk) f tiles
    avail = max(budget_bytes - out_buf, per_k * 128)
    tk_cap = max((avail // per_k) // 128 * 128, 128)

    hw128 = _round_up(hw, 128)
    if hw128 <= tk_cap:
        return hw128                               # whole (padded) HW in one chunk
    if hw % 128 == 0:
        # prefer a lane-aligned divisor of HW (>= 512 to amortize acc RMW) -> no padding
        cand = (tk_cap // 128) * 128
        while cand >= 512:
            if hw % cand == 0:
                return cand
            cand -= 128
    return tk_cap                                  # pad HW up to a multiple of tk_cap


# --------------------------------- wrapper ---------------------------------
def aiaw_loss(f_map_real, f_map_fake, eye_real, eye_fake,
              mask_matrix_real, mask_matrix_fake,
              margin_real, margin_fake,
              num_remove_cov_real, num_remove_cov_fake):
    """AIAW loss forward: (loss_real + loss_fake) / 2, each = sum(clamp(...)) / B."""
    B, C, H, W = f_map_real.shape
    assert f_map_fake.shape == (B, C, H, W)
    HW = H * W

    dtype = f_map_real.dtype
    dtype_bytes = jnp.dtype(dtype).itemsize
    tk = _choose_tk(HW, C, dtype_bytes)
    hw_pad = _round_up(HW, tk)
    n_k = hw_pad // tk

    def prep(f):
        f = f.reshape(B, C, HW)
        if hw_pad != HW:
            # zero padding contributes nothing to f @ f.T; normalization uses true HW
            f = jnp.pad(f, ((0, 0), (0, 0), (0, hw_pad - HW)))
        return f

    f_real = prep(f_map_real)
    f_fake = prep(f_map_fake.astype(dtype))

    vmem_need = 2 * 2 * C * tk * dtype_bytes + 2 * C * C * 4
    vmem_limit = int(min(max(vmem_need + (2 << 20), 16 << 20), 30 << 20))

    # One fused call; the non-selected branch's operand is pinned to block (0,0,0) so it
    # costs ~one tile of DMA total (Pallas skips the copy when the block index repeats).
    raw_cov = pl.pallas_call(
        _cov_kernel,
        out_shape=jax.ShapeDtypeStruct((2, B, C, C), jnp.float32),
        grid=(2, B, n_k),
        in_specs=[
            pl.BlockSpec((pl.Squeezed(), C, tk),
                         lambda br, b, k: (b * (1 - br), 0, k * (1 - br))),
            pl.BlockSpec((pl.Squeezed(), C, tk),
                         lambda br, b, k: (b * br, 0, k * br)),
        ],
        out_specs=pl.BlockSpec((pl.Squeezed(), pl.Squeezed(), C, C),
                               lambda br, b, k: (br, b, 0, 0)),
        compiler_params=pltpu.CompilerParams(
            dimension_semantics=("parallel", "parallel", "arbitrary"),
            vmem_limit_bytes=vmem_limit),
    )(f_real, f_fake)

    # ---- epilogue in JAX (tiny: 2B*C^2 elements), uses the actual eye / mask passed ----
    denom = float(HW - 1) if HW > 1 else 0.0   # matches torch .div() semantics

    def branch_loss(raw, eye, mask, margin, num_remove):
        cov = raw / denom + EPS * eye.astype(jnp.float32)
        masked = cov * mask.astype(jnp.float32)
        off_diag_sum = jnp.sum(jnp.abs(masked), axis=(1, 2), keepdims=True) - margin
        loss = jnp.maximum(off_diag_sum / num_remove, 0.0)
        return jnp.sum(loss) / B

    loss_real = branch_loss(raw_cov[0], eye_real, mask_matrix_real,
                            margin_real, num_remove_cov_real)
    loss_fake = branch_loss(raw_cov[1], eye_fake, mask_matrix_fake,
                            margin_fake, num_remove_cov_fake)
    return (loss_real + loss_fake) / 2.0


# ------------------------- pure-JAX reference (verification) -------------------------
def _ref_branch(f_map, eye, mask, margin, num_remove_cov):
    B, C, H, W = f_map.shape
    HW = H * W
    f = f_map.reshape(B, C, HW).astype(jnp.float32)
    cov = jnp.einsum("bci,bdi->bcd", f, f) / (HW - 1) + EPS * eye
    cov_masked = cov * mask
    off_diag_sum = jnp.sum(jnp.abs(cov_masked), axis=(1, 2), keepdims=True) - margin
    loss = jnp.maximum(off_diag_sum / num_remove_cov, 0.0)
    return jnp.sum(loss) / B


def _ref_loss(fr, ff, er, ef, mr, mf, gr, gf, nr, nf):
    return (_ref_branch(fr, er, mr, gr, nr) + _ref_branch(ff, ef, mf, gf, nf)) / 2.0


if __name__ == "__main__":
    B, C, H, W = 2, 4, 16, 16
    key = jax.random.PRNGKey(0)
    k1, k2, k3, k4 = jax.random.split(key, 4)

    f_map_real = jax.random.normal(k1, (B, C, H, W), dtype=jnp.float32)
    f_map_fake = jax.random.normal(k2, (B, C, H, W), dtype=jnp.float32)

    eye_real = jnp.eye(C, dtype=jnp.float32)
    eye_fake = jnp.eye(C, dtype=jnp.float32)

    # off-diagonal masks (per-batch) for selective (off-diag) covariance suppression
    off_diag = 1.0 - jnp.eye(C, dtype=jnp.float32)
    mask_matrix_real = jnp.broadcast_to(off_diag, (B, C, C))
    mask_matrix_fake = jnp.broadcast_to(off_diag, (B, C, C))

    margin_real = jnp.abs(jax.random.normal(k3, (B, 1, 1), dtype=jnp.float32)) * 0.1
    margin_fake = jnp.abs(jax.random.normal(k4, (B, 1, 1), dtype=jnp.float32)) * 0.1

    num_remove_cov_real = jnp.full((B, 1, 1), float(C * C - C), dtype=jnp.float32)
    num_remove_cov_fake = jnp.full((B, 1, 1), float(C * C - C), dtype=jnp.float32)

    loss = aiaw_loss(f_map_real, f_map_fake, eye_real, eye_fake,
                     mask_matrix_real, mask_matrix_fake,
                     margin_real, margin_fake,
                     num_remove_cov_real, num_remove_cov_fake)
    loss = jax.block_until_ready(loss)

    ref = _ref_loss(f_map_real, f_map_fake, eye_real, eye_fake,
                    mask_matrix_real, mask_matrix_fake,
                    margin_real, margin_fake,
                    num_remove_cov_real, num_remove_cov_fake)
    ref = jax.block_until_ready(ref)

    assert jnp.allclose(loss, ref, rtol=1e-4, atol=1e-5), (loss, ref)
    print("KERNEL_OK")
</pallas_src>

<mosaic_0001>
module attributes {stable_mosaic.version = 11 : i64} {
  func.func @_cov_kernel(%arg0: i32, %arg1: i32, %arg2: i32, %arg3: memref<1x4x256xf32, #tpu.memory_space<vmem>>, %arg4: memref<1x4x256xf32, #tpu.memory_space<vmem>>, %arg5: memref<1x1x4x4xf32, #tpu.memory_space<vmem>>) attributes {dimension_semantics = [#tpu.dimension_semantics<parallel>, #tpu.dimension_semantics<parallel>, #tpu.dimension_semantics<arbitrary>], iteration_bounds = array<i64: 2, 2, 1>, scalar_prefetch = 0 : i64, scratch_operands = 0 : i64, tpu.core_type = #tpu.core_type<tc>, window_params = [{transform_indices = @transform_0, window_bounds = array<i64: 1, 4, 256>}, {transform_indices = @transform_1, window_bounds = array<i64: 1, 4, 256>}, {transform_indices = @transform_2, window_bounds = array<i64: 1, 1, 4, 4>}]} {
    %c0_i32 = arith.constant 0 : i32
    %0 = arith.cmpi eq, %arg2, %c0_i32 : i32
    %1 = arith.extui %0 : i1 to i32
    %c0_i32_0 = arith.constant 0 : i32
    %2 = arith.cmpi ne, %1, %c0_i32_0 : i32
    scf.if %2 {
      %cst = arith.constant 0.000000e+00 : f32
      %9 = vector.broadcast %cst : f32 to vector<4x4xf32>
      %c0 = arith.constant 0 : index
      %c0_4 = arith.constant 0 : index
      %c0_5 = arith.constant 0 : index
      %c0_6 = arith.constant 0 : index
      %10 = vector.load %arg5[%c0, %c0_4, %c0_5, %c0_6] : memref<1x1x4x4xf32, #tpu.memory_space<vmem>>, vector<1x1x4x4xf32>
      %11 = vector.shape_cast %10 : vector<1x1x4x4xf32> to vector<4x4xf32>
      %12 = vector.shape_cast %9 : vector<4x4xf32> to vector<1x1x4x4xf32>
      tpu.vector_store %arg5[%c0, %c0_4, %c0_5, %c0_6], %12 {strides = array<i32>} : memref<1x1x4x4xf32, #tpu.memory_space<vmem>>, vector<1x1x4x4xf32>,
    } else {
    }
    %c0_i32_1 = arith.constant 0 : i32
    %3 = arith.cmpi eq, %arg0, %c0_i32_1 : i32
    %4 = arith.extui %3 : i1 to i32
    %c0_i32_2 = arith.constant 0 : i32
    %5 = arith.cmpi ne, %4, %c0_i32_2 : i32
    scf.if %5 {
      %c0 = arith.constant 0 : index
      %c0_4 = arith.constant 0 : index
      %c0_5 = arith.constant 0 : index
      %9 = vector.load %arg3[%c0, %c0_4, %c0_5] : memref<1x4x256xf32, #tpu.memory_space<vmem>>, vector<1x4x256xf32>
      %10 = vector.shape_cast %9 : vector<1x4x256xf32> to vector<4x256xf32>
      %c0_6 = arith.constant 0 : index
      %c0_7 = arith.constant 0 : index
      %c0_8 = arith.constant 0 : index
      %c0_9 = arith.constant 0 : index
      %11 = vector.load %arg5[%c0_6, %c0_7, %c0_8, %c0_9] : memref<1x1x4x4xf32, #tpu.memory_space<vmem>>, vector<1x1x4x4xf32>
      %12 = vector.shape_cast %11 : vector<1x1x4x4xf32> to vector<4x4xf32>
      %cst = arith.constant dense<0.000000e+00> : vector<4x4xf32>
      %13 = tpu.matmul %10, %10, %cst {dimension_numbers = #tpu.dot_dimension_numbers<[1], [1], [0], [0], [0, 0, 1, 0], [], []>} : vector<4x256xf32>, vector<4x256xf32>, vector<4x4xf32> -> vector<4x4xf32>
      %14 = arith.addf %12, %13 : vector<4x4xf32>
      %c0_10 = arith.constant 0 : index
      %c0_11 = arith.constant 0 : index
      %c0_12 = arith.constant 0 : index
      %c0_13 = arith.constant 0 : index
      %15 = vector.load %arg5[%c0_10, %c0_11, %c0_12, %c0_13] : memref<1x1x4x4xf32, #tpu.memory_space<vmem>>, vector<1x1x4x4xf32>
      %16 = vector.shape_cast %15 : vector<1x1x4x4xf32> to vector<4x4xf32>
      %17 = vector.shape_cast %14 : vector<4x4xf32> to vector<1x1x4x4xf32>
      tpu.vector_store %arg5[%c0_10, %c0_11, %c0_12, %c0_13], %17 {strides = array<i32>} : memref<1x1x4x4xf32, #tpu.memory_space<vmem>>, vector<1x1x4x4xf32>,
    } else {
    }
    %c1_i32 = arith.constant 1 : i32
    %6 = arith.cmpi eq, %arg0, %c1_i32 : i32
    %7 = arith.extui %6 : i1 to i32
    %c0_i32_3 = arith.constant 0 : i32
    %8 = arith.cmpi ne, %7, %c0_i32_3 : i32
    scf.if %8 {
      %c0 = arith.constant 0 : index
      %c0_4 = arith.constant 0 : index
      %c0_5 = arith.constant 0 : index
      %9 = vector.load %arg4[%c0, %c0_4, %c0_5] : memref<1x4x256xf32, #tpu.memory_space<vmem>>, vector<1x4x256xf32>
      %10 = vector.shape_cast %9 : vector<1x4x256xf32> to vector<4x256xf32>
      %c0_6 = arith.constant 0 : index
      %c0_7 = arith.constant 0 : index
      %c0_8 = arith.constant 0 : index
      %c0_9 = arith.constant 0 : index
      %11 = vector.load %arg5[%c0_6, %c0_7, %c0_8, %c0_9] : memref<1x1x4x4xf32, #tpu.memory_space<vmem>>, vector<1x1x4x4xf32>
      %12 = vector.shape_cast %11 : vector<1x1x4x4xf32> to vector<4x4xf32>
      %cst = arith.constant dense<0.000000e+00> : vector<4x4xf32>
      %13 = tpu.matmul %10, %10, %cst {dimension_numbers = #tpu.dot_dimension_numbers<[1], [1], [0], [0], [0, 0, 1, 0], [], []>} : vector<4x256xf32>, vector<4x256xf32>, vector<4x4xf32> -> vector<4x4xf32>
      %14 = arith.addf %12, %13 : vector<4x4xf32>
      %c0_10 = arith.constant 0 : index
      %c0_11 = arith.constant 0 : index
      %c0_12 = arith.constant 0 : index
      %c0_13 = arith.constant 0 : index
      %15 = vector.load %arg5[%c0_10, %c0_11, %c0_12, %c0_13] : memref<1x1x4x4xf32, #tpu.memory_space<vmem>>, vector<1x1x4x4xf32>
      %16 = vector.shape_cast %15 : vector<1x1x4x4xf32> to vector<4x4xf32>
      %17 = vector.shape_cast %14 : vector<4x4xf32> to vector<1x1x4x4xf32>
      tpu.vector_store %arg5[%c0_10, %c0_11, %c0_12, %c0_13], %17 {strides = array<i32>} : memref<1x1x4x4xf32, #tpu.memory_space<vmem>>, vector<1x1x4x4xf32>,
    } else {
    }
    return
  }
  func.func @transform_0(%arg0: i32, %arg1: i32, %arg2: i32) -> (i32, i32, i32) {
    %c1_i32 = arith.constant 1 : i32
    %0 = arith.subi %c1_i32, %arg0 : i32
    %1 = arith.muli %arg1, %0 : i32
    %c1_i32_0 = arith.constant 1 : i32
    %2 = arith.subi %c1_i32_0, %arg0 : i32
    %3 = arith.muli %arg2, %2 : i32
    %c0_i32 = arith.constant 0 : i32
    %c0_i32_1 = arith.constant 0 : i32
    return %1, %c0_i32, %3 : i32, i32, i32
  }
  func.func @transform_1(%arg0: i32, %arg1: i32, %arg2: i32) -> (i32, i32, i32) {
    %0 = arith.muli %arg1, %arg0 : i32
    %1 = arith.muli %arg2, %arg0 : i32
    %c0_i32 = arith.constant 0 : i32
    %c0_i32_0 = arith.constant 0 : i32
    return %0, %c0_i32, %1 : i32, i32, i32
  }
  func.func @transform_2(%arg0: i32, %arg1: i32, %arg2: i32) -> (i32, i32, i32, i32) {
    %c0_i32 = arith.constant 0 : i32
    %c0_i32_0 = arith.constant 0 : i32
    %c0_i32_1 = arith.constant 0 : i32
    return %arg0, %arg1, %c0_i32, %c0_i32_0 : i32, i32, i32, i32
  }
}

</mosaic_0001>

<bundles_post_ra>
// kernel: tpu_custom_call.1
= control target key start
LH: loop header
LB: loop body
LE: loop exit
PB: predicated region body
PF: predicated region fallthrough
CT: control target
= control target key end

     0   :  { %s1285_s0 = inlined_call_operand.hbm [shape: f32[2,4,256], index: 0, kind: input, shape index: {}]   ;;  %s1286_s1 = inlined_call_operand.hbm [shape: f32[2,4,256], index: 1, kind: input, shape index: {}]   ;;  %s1287_s2 = inlined_call_operand.hbm [shape: f32[2,2,4,4], index: 2, kind: output, shape index: {}]  }
   0x1   :  { %1295 = sst [smem:[#allocation15_spill]] %s1285_s0 }
   0x2   :  { %1296 = sst [smem:[#allocation16_spill]] %s1287_s2 }
   0x3   :  { %7 = vsyncpa [#allocation3], 0 }
   0x4   :  { %9 = vsyncpa [#allocation3 + $0x1], 0 }
   0x5   :  { %10 = vsyncpa [#allocation6], 0 }
   0x6   :  { %12 = vsyncpa [#allocation6 + $0x1], 0 }
   0x7   :  { %13 = vsyncpa [#allocation4], 0 }
   0x8   :  { %15 = vsyncpa [#allocation4 + $0x1], 0  ;;  %s938_s9 = smov 0   ;;  %s940_s10 = smov 0  }
   0x9   :  { %s942_s11 = smov 0   ;;  %s944_s12 = smov 0  }
   0xa   :  { %s946_s13 = smov 0   ;;  %s948_s14 = smov 0  }
   0xb   :  { %s950_s15 = smov 0   ;;  %s952_s16 = smov 0  }
   0xc   :  { %s954_s17 = smov 0   ;;  %s956_s18 = smov 0  }
   0xd   :  { %s958_s19 = smov 0   ;;  %s960_s20 = smov 0  }
   0xe   :  { %s962_s21 = smov 0   ;;  %s964_s22 = smov 0  }
   0xf LB: > { %1297 = sst [smem:[#allocation11_spill]] %s901_s18  ;;  %s550_s23 = sadd.s32 4294967295, %s917_s22   ;;  %s917_s22 = sphi %s964_s22, %s21_s22   ;;  %s913_s21 = sphi %s962_s21, %s1341_s21   ;;  %s909_s20 = sphi %s960_s20, %s1340_s20   ;;  %s905_s19 = sphi %s958_s19, %s1339_s19   ;;  %s901_s18 = sphi %s956_s18, %s1338_s18   ;;  %s897_s17 = sphi %s954_s17, %s1337_s17   ;;  %s893_s16 = sphi %s952_s16, %s1336_s16   ;;  %s889_s15 = sphi %s950_s15, %s1335_s15   ;;  %s885_s14 = sphi %s948_s14, %s1334_s14   ;;  %s881_s13 = sphi %s946_s13, %s1333_s13   ;;  %s877_s12 = sphi %s944_s12, %s1332_s12   ;;  %s873_s11 = sphi %s942_s11, %s1331_s11   ;;  %s869_s10 = sphi %s940_s10, %s1330_s10   ;;  %s865_s9 = sphi %s938_s9, %s1329_s9  }
  0x10   : > { %1298 = sst [smem:[#allocation12_spill]] %s905_s19  ;;  %s36_s25 = sadd.s32 1, %s909_s20 }
  0x11   : > { %s40_s26 = sadd.s32 1, %s913_s21  ;;  %p38_p0 = scmp.ge.s32.totalorder %s36_s25, 2 }
  0x12   : > { %s44_s27 = ssub.s32 1, %s913_s21  ;;  %s55_s29 = sadd.s32 1, %s897_s17 }
  0x13   : > { %s1012_s28 = smul.u32 %s909_s20, %s44_s27  ;;  %s1343_s25 = smov (%p38_p0, %s36_s25), 0 }
  0x14   : > { %s1345_s26 = smov (!%p38_p0, %s40_s26), %s913_s21  ;;  %p62_p1 = scmp.ne.s32.totalorder %s897_s17, %s893_s16 }
  0x15   : > { %p1290_p2 = scmp.eq.s32.totalorder %s917_s22, 0  ;;  %p42_p3 = scmp.ge.s32.totalorder %s1345_s26, 2 }
  0x16   : > { %p68_p4 = scmp.ne.s32.totalorder %s893_s16, %s889_s15  ;;  %p1028_p6 = scmp.eq.s32.totalorder %s550_s23, 0 }
  0x17   : > { %p1024_p5 = por %p1290_p2, %p62_p1  ;;  %s1347_s26 = smov (%p42_p3, %s1345_s26), 0 }
  0x18   : > { %1301 = sst [smem:[#allocation13_spill]] %s1347_s26  ;;  %p1036_p7 = por %p1028_p6, %p68_p4 }
  0x19   : > { %s111_s5 = ssub.s32 %s909_s20, %s1343_s25  ;;  %s47_s6 = ssub.s32 1, %s1347_s26 }
  0x1a   : > { %s1302_s4 = scalar_select %p1036_p7, 1, 0 }
  0x1b   : > { %s110_s7 = ssub.s32 %s913_s21, %s1347_s26  ;;  %s48_s8 = smul.u32 %s47_s6, %s1343_s25 }
  0x1c   : > { %s112_s15 = sor.u32 %s111_s5, %s110_s7  ;;  %s115_s27 = sadd.s32 1, %s873_s11 }
  0x1d   : > { %p113_p8 = scmp.eq.s32.totalorder %s112_s15, 0  ;;  %s50_s24 = ssub.s32 %s1012_s28, %s48_s8 }
  0x1e   : > { %p125_p9 = scmp.ne.s32.totalorder %s873_s11, %s869_s10  ;;  %p53_p10 = scmp.eq.s32.totalorder %s50_s24, 0 }
  0x1f   : > { %p126_p11 = scmp.eq.s32.totalorder %s550_s23, 3  ;;  %p131_p13 = scmp.ne.s32.totalorder %s869_s10, %s865_s9 }
  0x20   : > { %s1051_s2 = scalar_select %p113_p8, %s873_s11, %s115_s27  }
  0x21   : > { %s1054_s18 = scalar_select %p53_p10, %s897_s17, %s55_s29  }
  0x22   : > { %p1056_p12 = por %p126_p11, %p125_p9  ;;  %s1305_s5 = sadd.s32 4294967294, %s917_s22  }
  0x23   : > { %1303 = sst [smem:[#allocation14_spill]] %s1054_s18  ;;  %p132_p0 = scmp.eq.s32.totalorder %s1305_s5, 3 }
  0x24   : > { %s1304_s19 = scalar_select %p1056_p12, 1, 0 }
  0x25   : > { %p1289_p1 = scmp.lt.s32.totalorder %s917_s22, 4  ;;  %s152_s6 = sand.u32 1, %s897_s17  }
  0x26   : > { %p1066_p3 = por %p132_p0, %p131_p13  ;;  %s554_s23 = sshll.u32 %s152_s6, 3 }
  0x27   : > { %s571_s24 = sshll.u32 %s1012_s28, 7  ;;  %s1307_s0 = sld [smem:[#allocation15_spill]] }
  0x28   : > { %s1306_s7 = scalar_select %p1066_p3, 1, 0 }
  0x29   : > { %s156_s27 = scalar_lea.vmem [#allocation2], %s554_s23  ;;  %p1080_p4 = pnand %p1289_p1, %p1024_p5 }
  0x2a   : > { %s169_s18 = sshll.u32 %s156_s27, 4  ;;  %s153_s28 = scalar_lea.sflag [#allocation3], %s152_s6  ;;  %s1084_s18 = int_to_ptr.vmem [resolvable:$true] %s169_s18 }
  0x2b   : > { %p709_p11 = pneg %p1080_p4 }
  0x2d   : > { %s1074_s29 = scalar_lea.hbm %s1307_s0, %s571_s24  ;;  %s712_s8 = scalar_lea.hbm %s1307_s0, 256 }
  0x2e   : > { %s707_s24 = scalar_lea.hbm %s1074_s29, 128  ;;  %p713_p5 = scmp.lt.u32.totalorder %s1074_s29, %s1307_s0 }
  0x2f   : > { %p708_p10 = scmp.ne.s32.totalorder %s1074_s29, %s707_s24  ;;  %p714_p1 = scmp.lt.u32.totalorder %s712_s8, %s707_s24 }
  0x30   : > { %p716_p8 = scmp.lt.u32.totalorder %s707_s24, %s1074_s29 }
  0x31   : > { %p710_p13 = pnand %p709_p11, %p708_p10  ;;  %p715_p2 = por %p714_p1, %p713_p5 }
  0x33   : > { %p711_p0 = pneg %p710_p13  ;;  %p717_p9 = por %p716_p8, %p715_p2 }
  0x35   : > { %p718_p3 = pnand %p717_p9, %p711_p0 }
  0x37   : > { %721 = shalt.err (!%p718_p3)
}
  0x38   : > { %s722_s6 = scalar_lea.vmem %s1084_s18, 128  ;;  %s919_s30 = smov [#allocation2]  }
  0x39   : > { %p723_p10 = scmp.ne.s32.totalorder %s1084_s18, %s722_s6  ;;  %s727_s23 = sshll.u32 %s919_s30, 4  ;;  %s728_s23 = int_to_ptr.vmem [resolvable:$false] %s727_s23 }
  0x3a   : > { %s729_s15 = scalar_lea.vmem %s728_s23, 256  ;;  %p730_p7 = scmp.lt.s32.totalorder %s1084_s18, %s728_s23 }
  0x3b   : > { %p725_p13 = pnand %p723_p10, %p709_p11  ;;  %p731_p1 = scmp.lt.s32.totalorder %s729_s15, %s722_s6 }
  0x3d   : > { %p726_p12 = pneg %p725_p13  ;;  %p732_p5 = por %p731_p1, %p730_p7 }
  0x3f   : > { %p733_p2 = pnand %p732_p5, %p726_p12 }
  0x41   : > { %736 = shalt.err (!%p733_p2)
}
  0x42   : > { %582 = dma.hbm_to_vmem [thread:$0]  (!%p1080_p4), %s1074_s29, 128, %s1084_s18, %s153_s28  }
  0x43   : > { %p1309_p7 = scmp.lt.s32.totalorder %s917_s22, 5  ;;  %p1310_p12 = scmp.ge.s32.totalorder %s917_s22, 1 }
  0x44   : > { %s78_s24 = smul.u32 %s909_s20, %s913_s21  ;;  %s87_s27 = sadd.s32 1, %s885_s14 }
  0x45   : > { %p1117_p3 = pnand %p1310_p12, %p1309_p7  ;;  %s80_s8 = smul.u32 %s1347_s26, %s1343_s25 }
  0x46   : > { %p94_p8 = scmp.ne.s32.totalorder %s885_s14, %s881_s13  ;;  %p100_p9 = scmp.ne.s32.totalorder %s881_s13, %s877_s12 }
  0x47   : > { %s82_s6 = ssub.s32 %s78_s24, %s80_s8  ;;  %s176_s30 = sand.u32 1, %s885_s14  }
  0x48   : > { %p85_p11 = scmp.eq.s32.totalorder %s82_s6, 0  ;;  %p1312_p0 = scmp.eq.s32.totalorder %s917_s22, 0 }
  0x49   : > { %p1135_p13 = por %p100_p9, %p1028_p6  ;;  %s557_s28 = sshll.u32 %s176_s30, 3 }
  0x4a   : > { %p96_p10 = por %p94_p8, %p1312_p0  ;;  %s572_s23 = sshll.u32 %s78_s24, 7 }
  0x4b   : > { %s1313_s18 = scalar_select %p1135_p13, 1, 0 }
  0x4c   : > { %s1140_s29 = scalar_select %p85_p11, %s885_s14, %s87_s27  }
  0x4d   : > { %s1145_s26 = scalar_lea.hbm %s1286_s1, %s572_s23  ;;  %s180_s12 = scalar_lea.vmem [#allocation5], %s557_s28 }
  0x4e   : > { %s192_s8 = sshll.u32 %s180_s12, 4  ;;  %p1314_p4 = scmp.lt.s32.totalorder %s917_s22, 4  ;;  %s1153_s8 = int_to_ptr.vmem [resolvable:$true] %s192_s8 }
  0x4f   : > { %s177_s24 = scalar_lea.sflag [#allocation6], %s176_s30  ;;  %s737_s27 = scalar_lea.hbm %s1145_s26, 128 }
  0x50   : > { %p1149_p6 = pnand %p1314_p4, %p96_p10  ;;  %p738_p1 = scmp.ne.s32.totalorder %s1145_s26, %s737_s27 }
  0x51   : > { %s742_s28 = scalar_lea.hbm %s1286_s1, 256  ;;  %p743_p12 = scmp.lt.u32.totalorder %s1145_s26, %s1286_s1 }
  0x52   : > { %p739_p5 = pneg %p1149_p6  ;;  %p744_p8 = scmp.lt.u32.totalorder %s742_s28, %s737_s27 }
  0x53   : > { %p746_p11 = scmp.lt.u32.totalorder %s737_s27, %s1145_s26 }
  0x54   : > { %p740_p2 = pnand %p739_p5, %p738_p1  ;;  %p745_p9 = por %p744_p8, %p743_p12 }
  0x56   : > { %p741_p7 = pneg %p740_p2  ;;  %p747_p0 = por %p746_p11, %p745_p9 }
  0x58   : > { %p748_p10 = pnand %p747_p0, %p741_p7 }
  0x5a   : > { %751 = shalt.err (!%p748_p10)
}
  0x5b   : > { %s752_s30 = scalar_lea.vmem %s1153_s8, 128  ;;  %s920_s12 = smov [#allocation5]  }
  0x5c   : > { %p753_p4 = scmp.ne.s32.totalorder %s1153_s8, %s752_s30  ;;  %s757_s0 = sshll.u32 %s920_s12, 4  ;;  %s758_s0 = int_to_ptr.vmem [resolvable:$false] %s757_s0 }
  0x5d   : > { %s759_s6 = scalar_lea.vmem %s758_s0, 256  ;;  %p760_p13 = scmp.lt.s32.totalorder %s1153_s8, %s758_s0 }
  0x5e   : > { %p755_p1 = pnand %p753_p4, %p739_p5  ;;  %p761_p12 = scmp.lt.s32.totalorder %s759_s6, %s752_s30 }
  0x60   : > { %p756_p2 = pneg %p755_p1  ;;  %p762_p8 = por %p761_p12, %p760_p13 }
  0x62   : > { %p763_p9 = pnand %p762_p8, %p756_p2 }
  0x64   : > { %766 = shalt.err (!%p763_p9)
}
  0x65   : > { %585 = dma.hbm_to_vmem [thread:$0]  (!%p1149_p6), %s1145_s26, 128, %s1153_s8, %s177_s24  }
  0x66   : > { %201 = sbr.rel (%p1117_p3) target bundleno = 602 (0x25a), region = 28  ;;  %s203_s27 = sand.u32 (!%p1117_p3), 1, %s893_s16  }
  0x67   : > { %s561_s28 = sshll.u32 (!%p1117_p3), %s203_s27, 3  ;;  %s204_s23 = scalar_lea.sflag (!%p1117_p3), [#allocation3], %s203_s27 }
  0x68   : > { %s207_s15 = scalar_lea.vmem (!%p1117_p3), [#allocation2], %s561_s28  ;;  %p1316_p5 = scmp.ne.s32.totalorder (!%p1117_p3), %s1302_s4, 0 }
  0x6d   : > { %852 = dma.done.wait (%p1316_p5), %s204_s23, 128  }
  0x6e   : > { %854 = vsyncadd (%p1316_p5), %s204_s23, 4294967168  ;;  %s212_s3 = sand.u32 1, %s881_s13   ;;  %p1317_p13 = scmp.ne.s32.totalorder %s1313_s18, 0 }
  0x6f   : > { %s562_s30 = sshll.u32 %s212_s3, 3  ;;  %s213_s12 = scalar_lea.sflag [#allocation6], %s212_s3 }
  0x70   : > { %s216_s26 = scalar_lea.vmem [#allocation5], %s562_s30 }
  0x71   : > { %856 = dma.done.wait (%p1317_p13), %s213_s12, 128  }
  0x72   : > { %858 = vsyncadd (%p1317_p13), %s213_s12, 4294967168  ;;  %s239_s5 = sand.u32 1, %s869_s10   ;;  %vm253_vm0 = vcmask 27648   ;;  %v921_v0 = vmov 0.0   ;;  %s1318_s4 = sld [smem:[#allocation12_spill]] }
  0x73   : > { %s563_s8 = sshll.u32 %s239_s5, 2 }
  0x74   : > { %s1195_s24 = scalar_lea.vmem [#allocation7], %s563_s8 }
  0x75   : > { %254 = vst.msk [vmem:[%s1195_s24] sm:$0xf] %vm253_vm0, %v921_v0 }
  0x78   : > { %p564_p3 = scmp.ne.s32.totalorder %s1318_s4, 0 }
  0x79   : > { %v259_v1 = vld [vmem:[%s207_s15] sm:$0xff] (!%p564_p3) }
  0x7a   : > { %258 = sbr.rel (%p564_p3) target bundleno = 343 (0x157), region = 44  ;;  %v262_v2 = vcombine.high (!%p564_p3), %v259_v1, %v259_v1 }
  0x7c   : > { %264 = vmatprep.subr.mxu0 (!%p564_p3), %v262_v2  ;;  %328 = vmatprep.mubr.f32.mxu0 (!%p564_p3), %v262_v2  ;;  %v260_v3 = vld [vmem:[%s1195_s24] sm:$0xf] (!%p564_p3) }
  0x7d   : > { %265 = vmatpush1.xpose.msra.mxu0 (!%p564_p3), %v259_v1 }
  0x80   : > { %329 = vmatmul.mubr.f32.vlgmr.msra.gmra.mrb[0].mxu0 (!%p564_p3), %v259_v1 }
 0x153   : > { %v330_v4 = vpop.f32.mrb[0].mxu0 }
 0x154   : > { %v334_v5 = vadd.f32 %v330_v4, %v260_v3  ;;  %v332_v6 = vpop.f32.mrb[1].mxu0 }
 0x156   : > { %336 = vst.msk [vmem:[%s1195_s24] sm:$0xf] %vm253_vm0, %v334_v5 }
 0x157 PF: > { %s1319_s18 = sld [smem:[#allocation12_spill]] }
 0x15d   : > { %p565_p6 = scmp.ne.s32.totalorder %s1319_s18, 1 }
 0x15e   : > { %v341_v7 = vld [vmem:[%s216_s26] sm:$0xff] (!%p565_p6)  ;;  %v342_v9 = vld [vmem:[%s1195_s24] sm:$0xf] (!%p565_p6) }
 0x15f   : > { %340 = sbr.rel (%p565_p6) target bundleno = 572 (0x23c), region = 48  ;;  %v344_v8 = vcombine.high (!%p565_p6), %v341_v7, %v341_v7 }
 0x161   : > { %346 = vmatprep.subr.mxu0 (!%p565_p6), %v344_v8  ;;  %410 = vmatprep.mubr.f32.mxu0 (!%p565_p6), %v344_v8 }
 0x162   : > { %347 = vmatpush1.xpose.msra.mxu0 (!%p565_p6), %v341_v7 }
 0x165   : > { %411 = vmatmul.mubr.f32.vlgmr.msra.gmra.mrb[0].mxu0 (!%p565_p6), %v341_v7 }
 0x238   : > { %v412_v10 = vpop.f32.mrb[0].mxu0 }
 0x239   : > { %v416_v11 = vadd.f32 %v412_v10, %v342_v9  ;;  %v414_v12 = vpop.f32.mrb[1].mxu0 }
 0x23b   : > { %418 = vst.msk [vmem:[%s1195_s24] sm:$0xf] %vm253_vm0, %v416_v11 }
 0x23c PF: > { %s1320_s0 = sld [smem:[#allocation12_spill]]  ;;  %s1321_s6 = sld [smem:[#allocation11_spill]] }
 0x23d   : > { %s435_s23 = sshll.u32 %s1195_s24, 4  ;;  %s1322_s12 = sld [smem:[#allocation16_spill]]  ;;  %s1210_s23 = int_to_ptr.vmem [resolvable:$true] %s435_s23 }
 0x23e   : > { %s420_s4 = scalar_lea.sflag [#allocation4], %s239_s5  ;;  %s767_s18 = scalar_lea.vmem %s1210_s23, 64 }
 0x23f   : > { %p768_p7 = scmp.ne.s32.totalorder %s1210_s23, %s767_s18  ;;  %p1324_p11 = scmp.ne.s32.totalorder %s1304_s19, 0 }
 0x241   : > { %p769_p0 = pnand %p768_p7, %p1324_p11 }
 0x242   : > { %s567_s27 = sshll.u32 %s1320_s0, 1  ;;  %s922_s0 = smov [#allocation7]  }
 0x243   : > { %s431_s28 = sadd.s32 %s1321_s6, %s567_s27  ;;  %s1323_s26 = smov %s1322_s12 }
 0x244   : > { %s568_s15 = sshll.u32 %s431_s28, 6  ;;  %p770_p10 = pneg %p769_p0 }
 0x245   : > { %s433_s8 = scalar_lea.hbm %s1322_s12, %s568_s15  ;;  %s771_s6 = sshll.u32 %s922_s0, 4  ;;  %s772_s6 = int_to_ptr.vmem [resolvable:$false] %s771_s6 }
 0x246   : > { %s773_s24 = scalar_lea.vmem %s772_s6, 128  ;;  %p774_p4 = scmp.lt.s32.totalorder %s1210_s23, %s772_s6 }
 0x247   : > { %p775_p1 = scmp.lt.s32.totalorder %s773_s24, %s767_s18 }
 0x249   : > { %p776_p2 = por %p775_p1, %p774_p4 }
 0x24b   : > { %p777_p12 = pnand %p776_p2, %p770_p10 }
 0x24d   : > { %780 = shalt.err (!%p777_p12)
}
 0x24e   : > { %s781_s27 = scalar_lea.hbm %s433_s8, 64  ;;  %s785_s15 = scalar_lea.hbm %s1323_s26, 256 }
 0x24f   : > { %p782_p8 = scmp.ne.s32.totalorder %s433_s8, %s781_s27  ;;  %p786_p13 = scmp.lt.u32.totalorder %s433_s8, %s1323_s26 }
 0x250   : > { %p787_p3 = scmp.lt.u32.totalorder %s785_s15, %s781_s27  ;;  %p789_p7 = scmp.lt.u32.totalorder %s781_s27, %s433_s8 }
 0x251   : > { %p783_p9 = pnand %p782_p8, %p1324_p11 }
 0x252   : > { %p788_p6 = por %p787_p3, %p786_p13 }
 0x253   : > { %p784_p5 = pneg %p783_p9 }
 0x254   : > { %p790_p0 = por %p789_p7, %p788_p6 }
 0x256   : > { %p791_p10 = pnand %p790_p0, %p784_p5 }
 0x258   : > { %794 = shalt.err (!%p791_p10)
}
 0x259   : > { %577 = dma.vmem_to_hbm [thread:$0]  (%p1324_p11), %s1210_s23, 64, %s433_s8, %s420_s4  }
 0x25a PF: > { %p591_p4 = scmp.ge.s32.totalorder %s917_s22, 2  ;;  %s447_s12 = sand.u32 1, %s865_s9  }
 0x25b   : > { %p1325_p1 = scmp.ne.s32.totalorder %s1306_s7, 0  ;;  %s448_s18 = scalar_lea.sflag [#allocation4], %s447_s12 }
 0x25d   : > { %p587_p2 = pnand %p591_p4, %p1325_p1 }
 0x25f   : > { %860 = dma.done.wait (!%p587_p2), %s448_s18, 64  }
 0x260   : > { %862 = vsyncadd (!%p587_p2), %s448_s18, 4294967232  ;;  %s21_s22 = sadd.s32 1, %s917_s22   ;;  %s1327_s19 = sld [smem:[#allocation14_spill]] }
 0x261   : > { %p1238_p12 = scmp.ge.s32.totalorder %s21_s22, 6   ;;  %s1328_s7 = sld [smem:[#allocation13_spill]] }
 0x262   : > { %s1329_s9 = smov %s869_s10  ;;  %s1330_s10 = smov %s873_s11 }
 0x263   : > { %s1331_s11 = smov %s1051_s2  ;;  %s1332_s12 = smov %s881_s13 }
 0x264   : > { %s1333_s13 = smov %s885_s14  ;;  %s1334_s14 = smov %s1140_s29 }
 0x265   : > { %s1335_s15 = smov %s893_s16  ;;  %s1336_s16 = smov %s897_s17 }
 0x266   : > { %s1337_s17 = smov %s1327_s19  ;;  %s1338_s18 = smov %s909_s20 }
 0x267   : > { %s1339_s19 = smov %s913_s21  ;;  %s1340_s20 = smov %s1343_s25 }
 0x268   : > { %s1341_s21 = smov %s1328_s7  ;;  %20 = sbr.rel (!%p1238_p12) target bundleno = 15 (0xf), region = 98 }
 0x26f   :  { %453 = vsyncpa [#allocation3], 1 }
 0x270   :  { %455 = vsyncpa [#allocation3 + $0x1], 1 }
 0x271   :  { %456 = vsyncpa [#allocation6], 1 }
 0x272   :  { %458 = vsyncpa [#allocation6 + $0x1], 1 }
 0x273   :  { %459 = vsyncpa [#allocation4], 1 }
 0x274   :  { %461 = vsyncpa [#allocation4 + $0x1], 1 }

</bundles_post_ra>
